<compile_context>
chip_gen: v6e
topology: v6e:2x2x1
jax: 0.10.0
libtpu: 0.0.40
codegen_flags: <defaults>
</compile_context>

<pallas_src>
import jax
import jax.numpy as jnp
from jax import lax
from jax.experimental import pallas as pl
from jax.experimental.pallas import tpu as pltpu


# ------------------------------- small helpers ------------------------------ #

def _round_up(x, m):
    return ((x + m - 1) // m) * m


def _round_down(x, m):
    return (x // m) * m


def _vmem_budget_bytes():
    """Tile budget for double-buffered (in + out) blocks.

    Conservative 16 MiB default is v7x-safe (64 MiB physical / 32 MiB scoped);
    loosened to 32 MiB on 128-MiB-VMEM parts (v5e / v6e) so large-C configs
    keep >= ~2048-lane tiles."""
    try:
        if pltpu.get_tpu_info().vmem_capacity_bytes >= 100 * 1024 * 1024:
            return 32 * 1024 * 1024
    except Exception:
        pass
    return 16 * 1024 * 1024


def _pick_tile_lanes(hw, c, itemsize, budget, *, align=512, cap=16384, min_steps=4):
    """Lane tile (pixels) for the MXU path: large, lane-dense, but split into
    >= min_steps grid steps when HW allows (megacore + pipeline overlap)."""
    c_pad = _round_up(c, 8)                       # sublane padding of (C, tile) blocks
    fit = budget // (4 * c_pad * itemsize)        # 2 buffers x (in + out)
    cap = max(align, min(cap, _round_down(fit, align)))
    if hw <= align:
        return hw                                 # single full tile (== array dim: legal)
    tgt = _round_up((hw + min_steps - 1) // min_steps, align)
    return max(align, min(cap, tgt))


def _pick_tile_rows(rows, c, itemsize, budget, *, align=8, cap=128, min_steps=4):
    """Row tile (rows of 128 pixels) for the VPU path.  cap=128 rows == 16384
    pixels per step, same roofline regime as the lane path."""
    fit = budget // (4 * c * 128 * itemsize)      # 2 buffers x (in + out)
    cap = max(align, min(cap, _round_down(fit, align)))
    if rows <= align:
        return rows                               # full extent (== array dim: legal)
    tgt = _round_up((rows + min_steps - 1) // min_steps, align)
    return max(align, min(cap, tgt))


# ------------------------------- Pallas kernels ----------------------------- #

def _conv1x1_mxu_kernel(w_ref, z_ref, o_ref):
    # General path: (C, C) @ (C, TILE_HW) channel mix on the MXU, f32 accumulation.
    o_ref[...] = jnp.dot(
        w_ref[...], z_ref[...], preferred_element_type=jnp.float32
    ).astype(o_ref.dtype)


def _make_vpu_kernel(c):
    # Small-C path (C <= 8): fully-precise f32 channel mix on the VPU.
    # W is scalars in SMEM (sreg broadcast); z / out blocks are (C, TR, 128),
    # so each channel plane is sublane+lane dense -> full vreg utilization and
    # the ~C^2 MACs/pixel stay hidden under the HBM stream.
    def kernel(w_ref, z_ref, o_ref):
        z = z_ref[...]                            # (C, TR, 128)
        for o in range(c):
            acc = w_ref[o, 0] * z[0]
            for cc in range(1, c):
                acc = acc + w_ref[o, cc] * z[cc]
            o_ref[o] = acc.astype(o_ref.dtype)
    return kernel


# ------------------------------- pallas_call wrappers ----------------------- #

def _conv1x1_vpu(w, z_ncp, *, tile_rows, donate_input, input_buffering):
    n, c, hw = z_ncp.shape
    rows = hw // 128
    itemsize = jnp.dtype(z_ncp.dtype).itemsize
    z4 = z_ncp.reshape(n, c, rows, 128)           # free view: pixels -> (sublane, lane)
    grid = (n, pl.cdiv(rows, tile_rows))

    blk_bytes = c * tile_rows * 128 * itemsize    # one (C, TR, 128) block
    vmem_limit = min(32 << 20, max(8 << 20, 4 * blk_bytes + (2 << 20)))
    zkw = {} if input_buffering is None else dict(
        pipeline_mode=pl.Buffered(int(input_buffering)))

    cost = pl.CostEstimate(
        flops=2 * c * c * n * hw, transcendentals=0,
        bytes_accessed=2 * n * c * hw * itemsize + c * c * jnp.dtype(w.dtype).itemsize)

    out4 = pl.pallas_call(
        _make_vpu_kernel(c),
        out_shape=jax.ShapeDtypeStruct((n, c, rows, 128), z_ncp.dtype),
        grid_spec=pltpu.PrefetchScalarGridSpec(
            num_scalar_prefetch=0,
            grid=grid,
            in_specs=[
                # Weight: whole (C, C) matrix resident in SMEM (scalar reads).
                pl.BlockSpec(memory_space=pltpu.MemorySpace.SMEM),
                # z: (1, C, TR, 128) block, batch squeezed -> kernel sees (C, TR, 128).
                pl.BlockSpec((None, c, tile_rows, 128), lambda i, j: (i, 0, j, 0), **zkw),
            ],
            out_specs=pl.BlockSpec((None, c, tile_rows, 128), lambda i, j: (i, 0, j, 0)),
        ),
        compiler_params=pltpu.CompilerParams(
            dimension_semantics=("parallel", "parallel"),
            vmem_limit_bytes=vmem_limit),
        cost_estimate=cost,
        input_output_aliases=({1: 0} if donate_input else {}),
    )(w, z4)
    return out4.reshape(n, c, hw)


def _conv1x1_mxu(w, z_ncp, *, tile_hw, donate_input, input_buffering):
    n, c, hw = z_ncp.shape
    itemsize = jnp.dtype(z_ncp.dtype).itemsize
    grid = (n, pl.cdiv(hw, tile_hw))

    c_pad = _round_up(c, 8)                       # sublane padding of (C, tile) blocks
    blk_bytes = c_pad * tile_hw * itemsize
    vmem_limit = min(32 << 20, max(8 << 20, 4 * blk_bytes + (2 << 20)))
    zkw = {} if input_buffering is None else dict(
        pipeline_mode=pl.Buffered(int(input_buffering)))

    cost = pl.CostEstimate(
        flops=2 * c * c * n * hw, transcendentals=0,
        bytes_accessed=2 * n * c * hw * itemsize + c * c * jnp.dtype(w.dtype).itemsize)

    return pl.pallas_call(
        _conv1x1_mxu_kernel,
        out_shape=jax.ShapeDtypeStruct((n, c, hw), z_ncp.dtype),
        grid_spec=pltpu.PrefetchScalarGridSpec(
            num_scalar_prefetch=0,
            grid=grid,
            in_specs=[
                # Weight: resident across the whole grid (constant index_map).
                pl.BlockSpec((c, c), lambda i, j: (0, 0)),
                # z: (1, C, tile_hw) block, batch squeezed -> kernel sees (C, tile_hw).
                pl.BlockSpec((None, c, tile_hw), lambda i, j: (i, 0, j), **zkw),
            ],
            out_specs=pl.BlockSpec((None, c, tile_hw), lambda i, j: (i, 0, j)),
        ),
        compiler_params=pltpu.CompilerParams(
            dimension_semantics=("parallel", "parallel"),
            vmem_limit_bytes=vmem_limit),
        cost_estimate=cost,
        input_output_aliases=({1: 0} if donate_input else {}),
    )(w, z_ncp)


def conv1x1_pallas(w, z_ncp, *, tile_hw=None, vmem_budget_bytes=None,
                   donate_input=False, input_buffering=None):
    """out[n, :, p] = W @ z[n, :, p] for z of shape (N, C, HW).

    donate_input=True aliases z's buffer to the output (only if the caller no
    longer needs z).  input_buffering=3 requests deeper input pipelining if a
    trace shows step-boundary DMA seams.  Both default off."""
    n, c, hw = z_ncp.shape
    itemsize = jnp.dtype(z_ncp.dtype).itemsize
    budget = vmem_budget_bytes if vmem_budget_bytes is not None else _vmem_budget_bytes()

    if c <= 8 and hw % 128 == 0:
        rows = hw // 128
        if tile_hw is None:
            tr = _pick_tile_rows(rows, c, itemsize, budget)
        else:
            tr = max(1, int(tile_hw) // 128)
            if tr >= rows or rows <= 8:
                tr = rows
            else:
                tr = min(rows, max(8, _round_down(tr, 8)))
        return _conv1x1_vpu(w, z_ncp, tile_rows=tr,
                            donate_input=donate_input, input_buffering=input_buffering)

    if tile_hw is None:
        tile_hw = _pick_tile_lanes(hw, c, itemsize, budget)
    else:
        tile_hw = min(int(tile_hw), hw)
        if tile_hw < hw:
            tile_hw = max(128, _round_down(tile_hw, 128))
    return _conv1x1_mxu(w, z_ncp, tile_hw=tile_hw,
                        donate_input=donate_input, input_buffering=input_buffering)


# --------------------- parameter -> weight construction --------------------- #

def build_weight(S, U, v):
    """w = Q @ R, matching the PyTorch module.

    Q is a product of C Householder reflections built from v[i] (shape (C, 1));
    R is upper-triangular with diagonal S and strict-upper part U."""
    c = S.shape[0]
    u_mask = jnp.triu(jnp.ones((c, c), jnp.float32), 1)
    r = U * u_mask + jnp.diag(S)
    eye = jnp.eye(c, dtype=jnp.float32)

    def body(i, q):
        vi = v[i]                                  # (C, 1)
        q_i = eye - 2.0 * (vi @ vi.T) / (vi.T @ vi)
        return q @ q_i

    q = lax.fori_loop(0, c, body, eye)
    w = q @ r
    log_s_sum = jnp.sum(jnp.log(jnp.abs(S)))
    return w, log_s_sum


# ------------------------------ module forward ------------------------------ #

def invertible_conv1x1_forward(z, logdet, S, U, v, *, tile_hw=None,
                               donate_input=False, input_buffering=None):
    """Forward pass (reverse=False) of InvertibleConv1x1.

    z: (N, C, H, W) float32 (NCHW); logdet: scalar.
    Returns (z_out (N, C, H, W), logdet_out)."""
    n, c, h, w_dim = z.shape
    w, log_s_sum = build_weight(S, U, v)
    z_flat = z.reshape(n, c, h * w_dim)            # free, contiguous view of NCHW
    out_flat = conv1x1_pallas(w, z_flat, tile_hw=tile_hw,
                              donate_input=donate_input,
                              input_buffering=input_buffering)
    out = out_flat.reshape(n, c, h, w_dim)
    logdet_out = logdet + log_s_sum * (h * w_dim)
    return out, logdet_out
    # TODO(synk): reverse=True branch (torch.inverse of R, transposed Q) not implemented here.


# ----------------------------------- test ----------------------------------- #

if __name__ == "__main__":
    key = jax.random.PRNGKey(0)
    k_z, k_v, k_z2, k_z3 = jax.random.split(key, 4)

    # Module config: num_channels = 4; small NCHW input.
    N, C, H, W = 2, 4, 16, 16

    # Deterministic parameter init matching __init__ shapes:
    S = jnp.ones((C,), jnp.float32)                        # np_s = ones
    U = jnp.zeros((C, C), jnp.float32)                     # np_u = triu(zeros, 1)
    v = jax.random.normal(k_v, (C, C, 1), jnp.float32)     # v ~ randn(C, C, 1)

    w_ref, log_s_sum_ref = build_weight(S, U, v)

    # --- Test 1: primary path (C<=8, HW%128==0 -> exact-f32 VPU kernel) ------ #
    z = jax.random.normal(k_z, (N, C, H, W), jnp.float32)
    logdet = jnp.zeros((), jnp.float32)
    out, logdet_out = invertible_conv1x1_forward(z, logdet, S, U, v)
    out = jax.block_until_ready(out)
    logdet_out = jax.block_until_ready(logdet_out)
    out_ref = jnp.einsum("oc,nchw->nohw", w_ref, z, precision=lax.Precision.HIGHEST)
    assert jnp.allclose(out, out_ref, atol=1e-4, rtol=1e-4)
    assert jnp.allclose(logdet_out, logdet + log_s_sum_ref * (H * W))

    # --- Test 2: MXU fallback path (HW not divisible by 128) with a forced ---
    # small tile, exercising the cdiv grid + masked tail-block writeback. ------ #
    H2, W2 = 16, 18                                        # HW = 288, tile = 128
    z2 = jax.random.normal(k_z2, (N, C, H2, W2), jnp.float32)
    out2, logdet2 = invertible_conv1x1_forward(z2, logdet, S, U, v, tile_hw=128)
    out2 = jax.block_until_ready(out2)
    out2_ref = jnp.einsum("oc,nchw->nohw", w_ref, z2)
    assert jnp.allclose(out2, out2_ref, atol=1e-4, rtol=1e-4)
    assert jnp.allclose(logdet2, logdet + log_s_sum_ref * (H2 * W2))

    # --- Test 3: VPU path with multiple HW grid steps and a partial tail ----- #
    H3, W3 = 48, 48                                        # HW = 2304 -> 18 rows of 128
    z3 = jax.random.normal(k_z3, (N, C, H3, W3), jnp.float32)
    out3, logdet3 = invertible_conv1x1_forward(z3, logdet, S, U, v)
    out3 = jax.block_until_ready(out3)
    out3_ref = jnp.einsum("oc,nchw->nohw", w_ref, z3, precision=lax.Precision.HIGHEST)
    assert jnp.allclose(out3, out3_ref, atol=1e-4, rtol=1e-4)
    assert jnp.allclose(logdet3, logdet + log_s_sum_ref * (H3 * W3))

    print("KERNEL_OK")
</pallas_src>

<mosaic_0001>
module attributes {stable_mosaic.version = 11 : i64} {
  func.func @kernel(%arg0: i32, %arg1: i32, %arg2: memref<4x4xf32, #tpu.memory_space<smem>>, %arg3: memref<1x4x2x128xf32, #tpu.memory_space<vmem>>, %arg4: memref<1x4x2x128xf32, #tpu.memory_space<vmem>>) attributes {dimension_semantics = [#tpu.dimension_semantics<parallel>, #tpu.dimension_semantics<parallel>], iteration_bounds = array<i64: 2, 1>, scalar_prefetch = 0 : i64, scratch_operands = 0 : i64, tpu.core_type = #tpu.core_type<tc>, window_params = [{transform_indices = @transform_0, window_bounds = array<i64: 4, 4>}, {transform_indices = @transform_1, window_bounds = array<i64: 1, 4, 2, 128>}, {transform_indices = @transform_2, window_bounds = array<i64: 1, 4, 2, 128>}]} {
    %c0 = arith.constant 0 : index
    %c0_0 = arith.constant 0 : index
    %c0_1 = arith.constant 0 : index
    %c0_2 = arith.constant 0 : index
    %0 = vector.load %arg3[%c0, %c0_0, %c0_1, %c0_2] : memref<1x4x2x128xf32, #tpu.memory_space<vmem>>, vector<1x4x2x128xf32>
    %1 = vector.shape_cast %0 : vector<1x4x2x128xf32> to vector<4x2x128xf32>
    %c0_3 = arith.constant 0 : index
    %c0_4 = arith.constant 0 : index
    %2 = memref.load %arg2[%c0_3, %c0_4] : memref<4x4xf32, #tpu.memory_space<smem>>
    %3 = vector.extract_strided_slice %1 {offsets = [0, 0, 0], sizes = [1, 2, 128], strides = [1, 1, 1]} : vector<4x2x128xf32> to vector<1x2x128xf32>
    %4 = vector.shape_cast %3 : vector<1x2x128xf32> to vector<2x128xf32>
    %5 = vector.broadcast %2 : f32 to vector<2x128xf32>
    %6 = arith.mulf %5, %4 : vector<2x128xf32>
    %c0_5 = arith.constant 0 : index
    %c1 = arith.constant 1 : index
    %7 = memref.load %arg2[%c0_5, %c1] : memref<4x4xf32, #tpu.memory_space<smem>>
    %8 = vector.extract_strided_slice %1 {offsets = [1, 0, 0], sizes = [1, 2, 128], strides = [1, 1, 1]} : vector<4x2x128xf32> to vector<1x2x128xf32>
    %9 = vector.shape_cast %8 : vector<1x2x128xf32> to vector<2x128xf32>
    %10 = vector.broadcast %7 : f32 to vector<2x128xf32>
    %11 = arith.mulf %10, %9 : vector<2x128xf32>
    %12 = arith.addf %6, %11 : vector<2x128xf32>
    %c0_6 = arith.constant 0 : index
    %c2 = arith.constant 2 : index
    %13 = memref.load %arg2[%c0_6, %c2] : memref<4x4xf32, #tpu.memory_space<smem>>
    %14 = vector.extract_strided_slice %1 {offsets = [2, 0, 0], sizes = [1, 2, 128], strides = [1, 1, 1]} : vector<4x2x128xf32> to vector<1x2x128xf32>
    %15 = vector.shape_cast %14 : vector<1x2x128xf32> to vector<2x128xf32>
    %16 = vector.broadcast %13 : f32 to vector<2x128xf32>
    %17 = arith.mulf %16, %15 : vector<2x128xf32>
    %18 = arith.addf %12, %17 : vector<2x128xf32>
    %c0_7 = arith.constant 0 : index
    %c3 = arith.constant 3 : index
    %19 = memref.load %arg2[%c0_7, %c3] : memref<4x4xf32, #tpu.memory_space<smem>>
    %20 = vector.extract_strided_slice %1 {offsets = [3, 0, 0], sizes = [1, 2, 128], strides = [1, 1, 1]} : vector<4x2x128xf32> to vector<1x2x128xf32>
    %21 = vector.shape_cast %20 : vector<1x2x128xf32> to vector<2x128xf32>
    %22 = vector.broadcast %19 : f32 to vector<2x128xf32>
    %23 = arith.mulf %22, %21 : vector<2x128xf32>
    %24 = arith.addf %18, %23 : vector<2x128xf32>
    %c0_8 = arith.constant 0 : index
    %c0_9 = arith.constant 0 : index
    %c0_10 = arith.constant 0 : index
    %c0_11 = arith.constant 0 : index
    %25 = vector.load %arg4[%c0_8, %c0_9, %c0_10, %c0_11] : memref<1x4x2x128xf32, #tpu.memory_space<vmem>>, vector<1x1x2x128xf32>
    %26 = vector.shape_cast %25 : vector<1x1x2x128xf32> to vector<2x128xf32>
    %27 = vector.shape_cast %24 : vector<2x128xf32> to vector<1x1x2x128xf32>
    tpu.vector_store %arg4[%c0_8, %c0_9, %c0_10, %c0_11], %27 {strides = array<i32>} : memref<1x4x2x128xf32, #tpu.memory_space<vmem>>, vector<1x1x2x128xf32>,
    %c1_12 = arith.constant 1 : index
    %c0_13 = arith.constant 0 : index
    %28 = memref.load %arg2[%c1_12, %c0_13] : memref<4x4xf32, #tpu.memory_space<smem>>
    %29 = vector.extract_strided_slice %1 {offsets = [0, 0, 0], sizes = [1, 2, 128], strides = [1, 1, 1]} : vector<4x2x128xf32> to vector<1x2x128xf32>
    %30 = vector.shape_cast %29 : vector<1x2x128xf32> to vector<2x128xf32>
    %31 = vector.broadcast %28 : f32 to vector<2x128xf32>
    %32 = arith.mulf %31, %30 : vector<2x128xf32>
    %c1_14 = arith.constant 1 : index
    %c1_15 = arith.constant 1 : index
    %33 = memref.load %arg2[%c1_14, %c1_15] : memref<4x4xf32, #tpu.memory_space<smem>>
    %34 = vector.extract_strided_slice %1 {offsets = [1, 0, 0], sizes = [1, 2, 128], strides = [1, 1, 1]} : vector<4x2x128xf32> to vector<1x2x128xf32>
    %35 = vector.shape_cast %34 : vector<1x2x128xf32> to vector<2x128xf32>
    %36 = vector.broadcast %33 : f32 to vector<2x128xf32>
    %37 = arith.mulf %36, %35 : vector<2x128xf32>
    %38 = arith.addf %32, %37 : vector<2x128xf32>
    %c1_16 = arith.constant 1 : index
    %c2_17 = arith.constant 2 : index
    %39 = memref.load %arg2[%c1_16, %c2_17] : memref<4x4xf32, #tpu.memory_space<smem>>
    %40 = vector.extract_strided_slice %1 {offsets = [2, 0, 0], sizes = [1, 2, 128], strides = [1, 1, 1]} : vector<4x2x128xf32> to vector<1x2x128xf32>
    %41 = vector.shape_cast %40 : vector<1x2x128xf32> to vector<2x128xf32>
    %42 = vector.broadcast %39 : f32 to vector<2x128xf32>
    %43 = arith.mulf %42, %41 : vector<2x128xf32>
    %44 = arith.addf %38, %43 : vector<2x128xf32>
    %c1_18 = arith.constant 1 : index
    %c3_19 = arith.constant 3 : index
    %45 = memref.load %arg2[%c1_18, %c3_19] : memref<4x4xf32, #tpu.memory_space<smem>>
    %46 = vector.extract_strided_slice %1 {offsets = [3, 0, 0], sizes = [1, 2, 128], strides = [1, 1, 1]} : vector<4x2x128xf32> to vector<1x2x128xf32>
    %47 = vector.shape_cast %46 : vector<1x2x128xf32> to vector<2x128xf32>
    %48 = vector.broadcast %45 : f32 to vector<2x128xf32>
    %49 = arith.mulf %48, %47 : vector<2x128xf32>
    %50 = arith.addf %44, %49 : vector<2x128xf32>
    %c0_20 = arith.constant 0 : index
    %c1_21 = arith.constant 1 : index
    %c0_22 = arith.constant 0 : index
    %c0_23 = arith.constant 0 : index
    %51 = vector.load %arg4[%c0_20, %c1_21, %c0_22, %c0_23] : memref<1x4x2x128xf32, #tpu.memory_space<vmem>>, vector<1x1x2x128xf32>
    %52 = vector.shape_cast %51 : vector<1x1x2x128xf32> to vector<2x128xf32>
    %53 = vector.shape_cast %50 : vector<2x128xf32> to vector<1x1x2x128xf32>
    tpu.vector_store %arg4[%c0_20, %c1_21, %c0_22, %c0_23], %53 {strides = array<i32>} : memref<1x4x2x128xf32, #tpu.memory_space<vmem>>, vector<1x1x2x128xf32>,
    %c2_24 = arith.constant 2 : index
    %c0_25 = arith.constant 0 : index
    %54 = memref.load %arg2[%c2_24, %c0_25] : memref<4x4xf32, #tpu.memory_space<smem>>
    %55 = vector.extract_strided_slice %1 {offsets = [0, 0, 0], sizes = [1, 2, 128], strides = [1, 1, 1]} : vector<4x2x128xf32> to vector<1x2x128xf32>
    %56 = vector.shape_cast %55 : vector<1x2x128xf32> to vector<2x128xf32>
    %57 = vector.broadcast %54 : f32 to vector<2x128xf32>
    %58 = arith.mulf %57, %56 : vector<2x128xf32>
    %c2_26 = arith.constant 2 : index
    %c1_27 = arith.constant 1 : index
    %59 = memref.load %arg2[%c2_26, %c1_27] : memref<4x4xf32, #tpu.memory_space<smem>>
    %60 = vector.extract_strided_slice %1 {offsets = [1, 0, 0], sizes = [1, 2, 128], strides = [1, 1, 1]} : vector<4x2x128xf32> to vector<1x2x128xf32>
    %61 = vector.shape_cast %60 : vector<1x2x128xf32> to vector<2x128xf32>
    %62 = vector.broadcast %59 : f32 to vector<2x128xf32>
    %63 = arith.mulf %62, %61 : vector<2x128xf32>
    %64 = arith.addf %58, %63 : vector<2x128xf32>
    %c2_28 = arith.constant 2 : index
    %c2_29 = arith.constant 2 : index
    %65 = memref.load %arg2[%c2_28, %c2_29] : memref<4x4xf32, #tpu.memory_space<smem>>
    %66 = vector.extract_strided_slice %1 {offsets = [2, 0, 0], sizes = [1, 2, 128], strides = [1, 1, 1]} : vector<4x2x128xf32> to vector<1x2x128xf32>
    %67 = vector.shape_cast %66 : vector<1x2x128xf32> to vector<2x128xf32>
    %68 = vector.broadcast %65 : f32 to vector<2x128xf32>
    %69 = arith.mulf %68, %67 : vector<2x128xf32>
    %70 = arith.addf %64, %69 : vector<2x128xf32>
    %c2_30 = arith.constant 2 : index
    %c3_31 = arith.constant 3 : index
    %71 = memref.load %arg2[%c2_30, %c3_31] : memref<4x4xf32, #tpu.memory_space<smem>>
    %72 = vector.extract_strided_slice %1 {offsets = [3, 0, 0], sizes = [1, 2, 128], strides = [1, 1, 1]} : vector<4x2x128xf32> to vector<1x2x128xf32>
    %73 = vector.shape_cast %72 : vector<1x2x128xf32> to vector<2x128xf32>
    %74 = vector.broadcast %71 : f32 to vector<2x128xf32>
    %75 = arith.mulf %74, %73 : vector<2x128xf32>
    %76 = arith.addf %70, %75 : vector<2x128xf32>
    %c0_32 = arith.constant 0 : index
    %c2_33 = arith.constant 2 : index
    %c0_34 = arith.constant 0 : index
    %c0_35 = arith.constant 0 : index
    %77 = vector.load %arg4[%c0_32, %c2_33, %c0_34, %c0_35] : memref<1x4x2x128xf32, #tpu.memory_space<vmem>>, vector<1x1x2x128xf32>
    %78 = vector.shape_cast %77 : vector<1x1x2x128xf32> to vector<2x128xf32>
    %79 = vector.shape_cast %76 : vector<2x128xf32> to vector<1x1x2x128xf32>
    tpu.vector_store %arg4[%c0_32, %c2_33, %c0_34, %c0_35], %79 {strides = array<i32>} : memref<1x4x2x128xf32, #tpu.memory_space<vmem>>, vector<1x1x2x128xf32>,
    %c3_36 = arith.constant 3 : index
    %c0_37 = arith.constant 0 : index
    %80 = memref.load %arg2[%c3_36, %c0_37] : memref<4x4xf32, #tpu.memory_space<smem>>
    %81 = vector.extract_strided_slice %1 {offsets = [0, 0, 0], sizes = [1, 2, 128], strides = [1, 1, 1]} : vector<4x2x128xf32> to vector<1x2x128xf32>
    %82 = vector.shape_cast %81 : vector<1x2x128xf32> to vector<2x128xf32>
    %83 = vector.broadcast %80 : f32 to vector<2x128xf32>
    %84 = arith.mulf %83, %82 : vector<2x128xf32>
    %c3_38 = arith.constant 3 : index
    %c1_39 = arith.constant 1 : index
    %85 = memref.load %arg2[%c3_38, %c1_39] : memref<4x4xf32, #tpu.memory_space<smem>>
    %86 = vector.extract_strided_slice %1 {offsets = [1, 0, 0], sizes = [1, 2, 128], strides = [1, 1, 1]} : vector<4x2x128xf32> to vector<1x2x128xf32>
    %87 = vector.shape_cast %86 : vector<1x2x128xf32> to vector<2x128xf32>
    %88 = vector.broadcast %85 : f32 to vector<2x128xf32>
    %89 = arith.mulf %88, %87 : vector<2x128xf32>
    %90 = arith.addf %84, %89 : vector<2x128xf32>
    %c3_40 = arith.constant 3 : index
    %c2_41 = arith.constant 2 : index
    %91 = memref.load %arg2[%c3_40, %c2_41] : memref<4x4xf32, #tpu.memory_space<smem>>
    %92 = vector.extract_strided_slice %1 {offsets = [2, 0, 0], sizes = [1, 2, 128], strides = [1, 1, 1]} : vector<4x2x128xf32> to vector<1x2x128xf32>
    %93 = vector.shape_cast %92 : vector<1x2x128xf32> to vector<2x128xf32>
    %94 = vector.broadcast %91 : f32 to vector<2x128xf32>
    %95 = arith.mulf %94, %93 : vector<2x128xf32>
    %96 = arith.addf %90, %95 : vector<2x128xf32>
    %c3_42 = arith.constant 3 : index
    %c3_43 = arith.constant 3 : index
    %97 = memref.load %arg2[%c3_42, %c3_43] : memref<4x4xf32, #tpu.memory_space<smem>>
    %98 = vector.extract_strided_slice %1 {offsets = [3, 0, 0], sizes = [1, 2, 128], strides = [1, 1, 1]} : vector<4x2x128xf32> to vector<1x2x128xf32>
    %99 = vector.shape_cast %98 : vector<1x2x128xf32> to vector<2x128xf32>
    %100 = vector.broadcast %97 : f32 to vector<2x128xf32>
    %101 = arith.mulf %100, %99 : vector<2x128xf32>
    %102 = arith.addf %96, %101 : vector<2x128xf32>
    %c0_44 = arith.constant 0 : index
    %c3_45 = arith.constant 3 : index
    %c0_46 = arith.constant 0 : index
    %c0_47 = arith.constant 0 : index
    %103 = vector.load %arg4[%c0_44, %c3_45, %c0_46, %c0_47] : memref<1x4x2x128xf32, #tpu.memory_space<vmem>>, vector<1x1x2x128xf32>
    %104 = vector.shape_cast %103 : vector<1x1x2x128xf32> to vector<2x128xf32>
    %105 = vector.shape_cast %102 : vector<2x128xf32> to vector<1x1x2x128xf32>
    tpu.vector_store %arg4[%c0_44, %c3_45, %c0_46, %c0_47], %105 {strides = array<i32>} : memref<1x4x2x128xf32, #tpu.memory_space<vmem>>, vector<1x1x2x128xf32>,
    return
  }
  func.func @transform_0(%arg0: i32, %arg1: i32) -> (i32, i32) {
    %c0_i32 = arith.constant 0 : i32
    %c0_i32_0 = arith.constant 0 : i32
    %c0_i32_1 = arith.constant 0 : i32
    return %c0_i32, %c0_i32_0 : i32, i32
  }
  func.func @transform_1(%arg0: i32, %arg1: i32) -> (i32, i32, i32, i32) {
    %c0_i32 = arith.constant 0 : i32
    %c0_i32_0 = arith.constant 0 : i32
    %c0_i32_1 = arith.constant 0 : i32
    return %arg0, %c0_i32, %arg1, %c0_i32_0 : i32, i32, i32, i32
  }
  func.func @transform_2(%arg0: i32, %arg1: i32) -> (i32, i32, i32, i32) {
    %c0_i32 = arith.constant 0 : i32
    %c0_i32_0 = arith.constant 0 : i32
    %c0_i32_1 = arith.constant 0 : i32
    return %arg0, %c0_i32, %arg1, %c0_i32_0 : i32, i32, i32, i32
  }
}

</mosaic_0001>

<bundles_post_ra>
// kernel: tpu_custom_call.1
= control target key start
LH: loop header
LB: loop body
LE: loop exit
PB: predicated region body
PF: predicated region fallthrough
CT: control target
= control target key end

     0   :  { %s802_s0 = inlined_call_operand.hbm [shape: f32[4,4], index: 0, kind: input, shape index: {}]   ;;  %s803_s1 = inlined_call_operand.hbm [shape: f32[2,4,2,128], index: 1, kind: input, shape index: {}]   ;;  %s804_s2 = inlined_call_operand.hbm [shape: f32[2,4,2,128], index: 2, kind: output, shape index: {}]  }
   0x1   :  { %805 = sst [smem:[#allocation11_spill]] %s802_s0 }
   0x2   :  { %7 = vsyncpa [#allocation5], 0 }
   0x3   :  { %8 = vsyncpa [#allocation3], 0 }
   0x4   :  { %10 = vsyncpa [#allocation3 + $0x1], 0 }
   0x5   :  { %11 = vsyncpa [#allocation4], 0 }
   0x6   :  { %13 = vsyncpa [#allocation4 + $0x1], 0  ;;  %s635_s9 = smov 0   ;;  %s637_s10 = smov 0  }
   0x7   :  { %s639_s11 = smov 0   ;;  %s641_s12 = smov 0  }
   0x8   :  { %s643_s13 = smov 0   ;;  %s645_s14 = smov 0  }
   0x9 LB: > { %s374_s15 = sadd.s32 4294967295, %s611_s14   ;;  %s375_s16 = sadd.s32 4294967294, %s611_s14   ;;  %s611_s14 = sphi %s645_s14, %s19_s14   ;;  %s607_s13 = sphi %s643_s13, %s819_s13   ;;  %s603_s12 = sphi %s641_s12, %s818_s12   ;;  %s599_s11 = sphi %s639_s11, %s817_s11   ;;  %s595_s10 = sphi %s637_s10, %s816_s10   ;;  %s591_s9 = sphi %s635_s9, %s815_s9  }
   0xa   : > { %s61_s17 = sadd.s32 1, %s599_s11  ;;  %p68_p0 = scmp.ne.s32.totalorder %s599_s11, %s595_s10 }
   0xb   : > { %p69_p1 = scmp.eq.s32.totalorder %s611_s14, 0  ;;  %p74_p2 = scmp.ne.s32.totalorder %s595_s10, %s591_s9 }
   0xc   : > { %p673_p3 = scmp.eq.s32.totalorder %s374_s15, 0  ;;  %p100_p4 = scmp.eq.s32.totalorder %s374_s15, 1 }
   0xd   : > { %p70_p5 = por %p69_p1, %p68_p0  ;;  %p106_p6 = scmp.eq.s32.totalorder %s375_s16, 1 }
   0xe   : > { %p679_p7 = por %p673_p3, %p74_p2  ;;  %p683_p8 = por %p100_p4, %p68_p0 }
   0xf   : > { %p687_p9 = por %p106_p6, %p74_p2  ;;  %p376_p10 = scmp.ge.s32.totalorder %s611_s14, 1 }
  0x10   : > { %p113_p11 = scmp.lt.s32.totalorder %s611_s14, 3  ;;  %p432_p1 = scmp.lt.s32.totalorder %s611_s14, 2 }
  0x11   : > { %s809_s21 = scalar_select %p687_p9, 1, 0 }
  0x12   : > { %p694_p13 = pnand %p376_p10, %p113_p11  ;;  %s135_s23 = sand.u32 1, %s599_s11  }
  0x13   : > { %p702_p2 = pnand %p432_p1, %p70_p5  ;;  %s31_s25 = sadd.s32 1, %s607_s13 }
  0x14   : > { %p419_p0 = pneg %p694_p13  ;;  %s379_s26 = sshll.u32 %s135_s23, 3 }
  0x15   : > { %p33_p6 = scmp.ge.s32.totalorder %s31_s25, 2  ;;  %s613_s27 = smov [#allocation2]  }
  0x16   : > { %p420_p4 = pnand %p419_p0, %p673_p3  ;;  %s812_s0 = sld [smem:[#allocation11_spill]] }
  0x17   : > { %s821_s25 = smov (%p33_p6, %s31_s25), 0  ;;  %s409_s30 = sshll.u32 %s607_s13, 7 }
  0x18   : > { %s56_s3 = ssub.s32 %s607_s13, %s821_s25  ;;  %s146_s6 = scalar_lea.hbm %s803_s1, %s409_s30 }
  0x19   : > { %p59_p5 = scmp.eq.s32.totalorder %s56_s3, 0  ;;  %s139_s7 = scalar_lea.vmem [#allocation6], %s379_s26 }
  0x1a   : > { %s147_s8 = sshll.u32 %s139_s7, 4  ;;  %s136_s16 = scalar_lea.sflag [#allocation3], %s135_s23  ;;  %s148_s8 = int_to_ptr.vmem [resolvable:$true] %s147_s8 }
  0x1b   : > { %s723_s15 = scalar_select %p59_p5, %s599_s11, %s61_s17  }
  0x1c   : > { %422 = dma.hbm_to_smem (!%p420_p4), %s812_s0, 64, %s613_s27, [#allocation5]  }
  0x1d   : > { %p501_p10 = pneg %p702_p2  ;;  %s512_s27 = scalar_lea.vmem %s148_s8, 128 }
  0x1e   : > { %p513_p11 = scmp.ne.s32.totalorder %s148_s8, %s512_s27  ;;  %s614_s28 = smov [#allocation6]  }
  0x1f   : > { %s517_s29 = sshll.u32 %s614_s28, 4  ;;  %s518_s29 = int_to_ptr.vmem [resolvable:$false] %s517_s29 }
  0x20   : > { %p515_p1 = pnand %p513_p11, %p501_p10  ;;  %s519_s0 = scalar_lea.vmem %s518_s29, 256 }
  0x21   : > { %p520_p4 = scmp.lt.s32.totalorder %s148_s8, %s518_s29  ;;  %p521_p6 = scmp.lt.s32.totalorder %s519_s0, %s512_s27 }
  0x22   : > { %p516_p0 = pneg %p515_p1 }
  0x23   : > { %p522_p12 = por %p521_p6, %p520_p4 }
  0x25   : > { %p523_p9 = pnand %p522_p12, %p516_p0 }
  0x27   : > { %526 = shalt.err (!%p523_p9)
}
  0x28   : > { %s615_s26 = smov 32   ;;  %s616_s17 = smov 2  }
  0x29   : > { %426 = dma.hbm_to_vmem [thread:$0]  (!%p702_p2), %s146_s6, 128, %s148_s8, %s136_s16, %s615_s26, %s615_s26, %s616_s17  }
  0x2a   : > { %159 = sbr.rel (%p694_p13) target bundleno = 96 (0x60), region = 28 }
  0x2f   : > { %578 = dma.done.wait (%p673_p3), [#allocation5], 64  }
  0x30   : > { %580 = vsyncadd (%p673_p3), [#allocation5], 4294967232  ;;  %s736_s0 = sand.u32 1, %s595_s10  }
  0x31   : > { %s384_s23 = sshll.u32 %s736_s0, 3  ;;  %s166_s30 = scalar_lea.sflag [#allocation3], %s736_s0 }
  0x32   : > { %s169_s24 = scalar_lea.vmem [#allocation6], %s384_s23 }
  0x33   : > { %582 = dma.done.wait (%p679_p7), %s166_s30, 128  }
  0x34   : > { %584 = vsyncadd (%p679_p7), %s166_s30, 4294967168 }
  0x35   : > { %174 = sfence }
  0x36   : > { %s195_s22 = sld [smem:[#allocation2]]  ;;  %v191_v0 = vld [vmem:[%s169_s24] sm:$0x3]  ;;  %v192_v1 = vld [vmem:[%s169_s24 + $0x2] sm:$0x3] }
  0x37   : > { %s386_s18 = sld [smem:[#allocation2 + $0x1]]  ;;  %v193_v2 = vld [vmem:[%s169_s24 + $0x4] sm:$0x3]  ;;  %v194_v4 = vld [vmem:[%s169_s24 + $0x6] sm:$0x3]  ;;  %s190_s24 = scalar_lea.vmem [#allocation7], %s384_s23 }
  0x38   : > { %s387_s3 = sld [smem:[#allocation2 + $0x2]]  ;;  %s277_s23 = sshll.u32 %s190_s24, 4  ;;  %s749_s23 = int_to_ptr.vmem [resolvable:$true] %s277_s23 }
  0x39   : > { %s388_s4 = sld [smem:[#allocation2 + $0x3]] }
  0x3a   : > { %s389_s5 = sld [smem:[#allocation2 + $0x80]] }
  0x3b   : > { %s390_s6 = sld [smem:[#allocation2 + $0x81]] }
  0x3c   : > { %v196_v3 = vstv %s195_s22  ;;  %s391_s7 = sld [smem:[#allocation2 + $0x82]]  ;;  %s410_s22 = sshll.u32 %s603_s12, 7 }
  0x3d   : > { %v197_v5 = vmul.f32 %v196_v3, %v191_v0  ;;  %v199_v6 = vstv %s386_s18  ;;  %s392_s8 = sld [smem:[#allocation2 + $0x83]]  ;;  %s617_s12 = smov [#allocation7]  }
  0x3e   : > { %v200_v7 = vmul.f32 %v199_v6, %v192_v1  ;;  %v203_v8 = vstv %s387_s3  ;;  %s394_s19 = sld [smem:[#allocation2 + $0x100]] }
  0x3f   : > { %v204_v9 = vmul.f32 %v203_v8, %v193_v2  ;;  %v207_v10 = vstv %s388_s4  ;;  %s395_s16 = sld [smem:[#allocation2 + $0x101]]  ;;  %s754_s4 = scalar_lea.hbm %s804_s2, %s410_s22 }
  0x40   : > { %v201_v11 = vadd.f32 %v200_v7, %v197_v5  ;;  %v208_v12 = vmul.f32 %v207_v10, %v194_v4  ;;  %v212_v13 = vstv %s389_s5  ;;  %s396_s27 = sld [smem:[#allocation2 + $0x102]]  ;;  %s263_s5 = scalar_lea.sflag [#allocation4], %s736_s0 }
  0x41   : > { %v213_v14 = vmul.f32 %v212_v13, %v191_v0  ;;  %v215_v15 = vstv %s390_s6  ;;  %s397_s28 = sld [smem:[#allocation2 + $0x103]]  ;;  %s527_s6 = scalar_lea.vmem %s749_s23, 128 }
  0x42   : > { %v205_v16 = vadd.f32 %v204_v9, %v201_v11  ;;  %v216_v17 = vmul.f32 %v215_v15, %v192_v1  ;;  %v219_v18 = vstv %s391_s7  ;;  %s399_s29 = sld [smem:[#allocation2 + $0x180]]  ;;  %p528_p3 = scmp.ne.s32.totalorder %s749_s23, %s527_s6 }
  0x43   : > { %v220_v19 = vmul.f32 %v219_v18, %v193_v2  ;;  %v223_v20 = vstv %s392_s8  ;;  %s400_s26 = sld [smem:[#allocation2 + $0x181]]  ;;  %s531_s7 = sshll.u32 %s617_s12, 4  ;;  %s532_s7 = int_to_ptr.vmem [resolvable:$false] %s531_s7 }
  0x44   : > { %v209_v21 = vadd.f32 %v208_v12, %v205_v16  ;;  %v217_v22 = vadd.f32 %v216_v17, %v213_v14  ;;  %v224_v23 = vmul.f32 %v223_v20, %v194_v4  ;;  %v229_v24 = vstv %s394_s19  ;;  %s401_s17 = sld [smem:[#allocation2 + $0x182]]  ;;  %p529_p7 = pnand %p528_p3, %p683_p8 }
  0x45   : > { %v230_v25 = vmul.f32 %v229_v24, %v191_v0  ;;  %v232_v26 = vstv %s395_s16  ;;  %s402_s30 = sld [smem:[#allocation2 + $0x183]]  ;;  %s533_s8 = scalar_lea.vmem %s532_s7, 256 }
  0x46   : > { %210 = vst [vmem:[%s190_s24] sm:$0x3] %v209_v21  ;;  %v221_v27 = vadd.f32 %v220_v19, %v217_v22  ;;  %v233_v28 = vmul.f32 %v232_v26, %v192_v1  ;;  %v236_v29 = vstv %s396_s27  ;;  %p530_p9 = pneg %p529_p7  ;;  %p534_p12 = scmp.lt.s32.totalorder %s749_s23, %s532_s7 }
  0x47   : > { %v237_v30 = vmul.f32 %v236_v29, %v193_v2  ;;  %v240_v31 = vstv %s397_s28  ;;  %p535_p13 = scmp.lt.s32.totalorder %s533_s8, %s527_s6 }
  0x48   : > { %v225_v32 = vadd.f32 %v224_v23, %v221_v27  ;;  %v234_v33 = vadd.f32 %v233_v28, %v230_v25  ;;  %v241_v34 = vmul.f32 %v240_v31, %v194_v4  ;;  %v246_v35 = vstv %s399_s29 }
  0x49   : > { %v247_v36 = vmul.f32 %v246_v35, %v191_v0  ;;  %v249_v37 = vstv %s400_s26  ;;  %p536_p2 = por %p535_p13, %p534_p12 }
  0x4a   : > { %393 = vst [vmem:[%s190_s24 + $0x2] sm:$0x3] %v225_v32  ;;  %v238_v38 = vadd.f32 %v237_v30, %v234_v33  ;;  %v250_v39 = vmul.f32 %v249_v37, %v192_v1  ;;  %v253_v40 = vstv %s401_s17 }
  0x4b   : > { %v254_v41 = vmul.f32 %v253_v40, %v193_v2  ;;  %v257_v42 = vstv %s402_s30  ;;  %p537_p5 = pnand %p536_p2, %p530_p9 }
  0x4c   : > { %v242_v43 = vadd.f32 %v241_v34, %v238_v38  ;;  %v251_v44 = vadd.f32 %v250_v39, %v247_v36  ;;  %v258_v45 = vmul.f32 %v257_v42, %v194_v4 }
  0x4e   : > { %398 = vst [vmem:[%s190_s24 + $0x4] sm:$0x3] %v242_v43  ;;  %v255_v46 = vadd.f32 %v254_v41, %v251_v44 }
  0x50   : > { %v259_v47 = vadd.f32 %v258_v45, %v255_v46 }
  0x52   : > { %403 = vst [vmem:[%s190_s24 + $0x6] sm:$0x3] %v259_v47 }
  0x53   : > { %540 = shalt.err (!%p537_p5)
}
  0x54   : > { %s541_s19 = scalar_lea.hbm %s754_s4, 128  ;;  %s545_s28 = scalar_lea.hbm %s804_s2, 256 }
  0x55   : > { %p542_p10 = scmp.ne.s32.totalorder %s754_s4, %s541_s19  ;;  %p546_p0 = scmp.lt.s32.totalorder %s754_s4, %s804_s2 }
  0x56   : > { %p547_p4 = scmp.lt.s32.totalorder %s545_s28, %s541_s19 }
  0x57   : > { %p543_p11 = pnand %p542_p10, %p683_p8 }
  0x58   : > { %p548_p6 = por %p547_p4, %p546_p0 }
  0x59   : > { %p544_p1 = pneg %p543_p11 }
  0x5b   : > { %p549_p3 = pnand %p548_p6, %p544_p1 }
  0x5d   : > { %552 = shalt.err (!%p549_p3)
}
  0x5e   : > { %s618_s17 = smov 32   ;;  %s619_s30 = smov 2  }
  0x5f   : > { %417 = dma.vmem_to_hbm [thread:$0]  (%p683_p8), %s749_s23, 128, %s754_s4, %s263_s5, %s618_s17, %s618_s17, %s619_s30  }
  0x60 PF: > { %s292_s24 = sand.u32 1, %s591_s9   ;;  %p813_p7 = scmp.ne.s32.totalorder %s809_s21, 0 }
  0x61   : > { %p814_p9 = scmp.ge.s32.totalorder %s611_s14, 2  ;;  %s293_s22 = scalar_lea.sflag [#allocation4], %s292_s24 }
  0x63   : > { %p428_p12 = pnand %p814_p9, %p813_p7 }
  0x65   : > { %p429_p13 = pneg %p428_p12 }
  0x67   : > { %586 = dma.done.wait (%p429_p13), %s293_s22, 128  }
  0x68   : > { %588 = vsyncadd (%p429_p13), %s293_s22, 4294967168  ;;  %s19_s14 = sadd.s32 1, %s611_s14   ;;  %s815_s9 = smov %s595_s10 }
  0x69   : > { %p16_p2 = scmp.ge.s32.totalorder %s19_s14, 4   ;;  %s816_s10 = smov %s599_s11 }
  0x6a   : > { %s817_s11 = smov %s723_s15  ;;  %s818_s12 = smov %s607_s13 }
  0x6b   : > { %s819_s13 = smov %s821_s25  ;;  %18 = sbr.rel (!%p16_p2) target bundleno = 9 (0x9), region = 81 }
  0x70   :  { %298 = vsyncpa [#allocation3], 1 }
  0x71   :  { %300 = vsyncpa [#allocation3 + $0x1], 1 }
  0x72   :  { %301 = vsyncpa [#allocation4], 1 }
  0x73   :  { %303 = vsyncpa [#allocation4 + $0x1], 1 }
  0x74   :  { %304 = vsyncpa [#allocation5], 1 }
  0x75   :  { %306 = vsyncpa [#allocation5 + $0x1], 1 }

</bundles_post_ra>
